<compile_context>
chip_gen: v7x
topology: tpu7x:2x2x1
jax: 0.10.0
libtpu: 0.0.40
codegen_flags: <defaults>
</compile_context>

<pallas_src>
import jax
import jax.numpy as jnp
from jax import lax
from jax.experimental import pallas as pl
from jax.experimental.pallas import tpu as pltpu


def _poisson_kernel(vf_ref, out_ref):
    # vf_ref: (TB, 2, H, W) block in VMEM; out_ref: (TB, 3, H, W) block in VMEM.
    TB, _, H, W = vf_ref.shape
    dt = vf_ref.dtype

    # Interior masks: reflect padding makes the boundary derivative exactly 0.
    # Built from thin (H,1)/(1,W) iotas instead of two full (H,W) i32 planes;
    # hoisted out of the batch unroll so they are materialized once per step.
    row = lax.broadcasted_iota(jnp.int32, (H, 1), 0)
    col = lax.broadcasted_iota(jnp.int32, (1, W), 1)
    iy = (row > 0) & (row < H - 1)         # (H, 1) interior rows
    ix = (col > 0) & (col < W - 1)         # (1, W) interior cols
    ixy = iy & ix                          # (H, W) interior of both
    zero = jnp.zeros((), dt)
    quarter = jnp.asarray(0.25, dt)        # (0.5 filter coeff)^2 folded once

    # Static unroll over the (small) per-step batch tile.
    for b in range(TB):
        u = vf_ref[b, 0, :, :]   # first vector component, (H, W)
        v = vf_ref[b, 1, :, :]   # second vector component, (H, W)

        # Unscaled central differences a[i+1] - a[i-1]; the circular wrap of
        # the rolls only touches boundary rows/cols, which are masked below.
        dyu = pltpu.roll(u, H - 1, 0) - pltpu.roll(u, 1, 0)
        dxu = pltpu.roll(u, W - 1, 1) - pltpu.roll(u, 1, 1)
        dyv = pltpu.roll(v, H - 1, 0) - pltpu.roll(v, 1, 0)
        dxv = pltpu.roll(v, W - 1, 1) - pltpu.roll(v, 1, 1)

        # ux^2 = (0.5*dxu)^2 etc.; mask only the three products.
        out_ref[b, 0, :, :] = jnp.where(ix, quarter * (dxu * dxu), zero)   # ux^2
        out_ref[b, 1, :, :] = jnp.where(iy, quarter * (dyv * dyv), zero)   # vy^2
        out_ref[b, 2, :, :] = jnp.where(ixy, quarter * (dyu * dxv), zero)  # uy*vx


def _pick_batch_tile(N, H, W, itemsize, max_tb=8, vmem_budget_bytes=8 * 1024 * 1024):
    # Per-item pipelined footprint: double-buffered input (2 * 2*H*W) + fused
    # double-buffered output (2 * 3*H*W)  ->  2 * 5 * H * W * itemsize bytes.
    per_item = 2 * (2 + 3) * H * W * itemsize
    tb = 1
    for cand in range(1, max_tb + 1):
        if N % cand == 0 and cand * per_item <= vmem_budget_bytes:
            tb = cand
    return tb


def poisson_pallas(vector_field):
    """vector_field: [N, 2, H, W] -> (ux2, vy2, uyvx), each [N, 1, H, W]."""
    N, C, H, W = vector_field.shape
    assert C == 2, "Poisson expects a 2-component vector field"
    dtype = vector_field.dtype
    tb = _pick_batch_tile(N, H, W, jnp.dtype(dtype).itemsize)
    # TODO(synk): for very large planes (per-item footprint beyond ~8 MiB) add
    # row tiling with a 1-row halo so the per-step block also fits v7x's 64 MiB
    # VMEM; full planes are kept here since the module's typical fields fit.

    fused = pl.pallas_call(
        _poisson_kernel,
        out_shape=jax.ShapeDtypeStruct((N, 3, H, W), dtype),
        grid=(N // tb,),
        in_specs=[pl.BlockSpec((tb, 2, H, W), lambda n: (n, 0, 0, 0))],
        out_specs=pl.BlockSpec((tb, 3, H, W), lambda n: (n, 0, 0, 0)),
        compiler_params=pltpu.CompilerParams(
            dimension_semantics=("parallel",),
            vmem_limit_bytes=32 * 1024 * 1024,
        ),
    )(vector_field)

    # Split the fused channel dim back into the module's three outputs.
    return fused[:, 0:1, :, :], fused[:, 1:2, :, :], fused[:, 2:3, :, :]


# ---- pure-JAX reference (mirrors the PyTorch module semantics) -------------
def _cdiff_ref(x):
    # x: [N, 1, H, W]; reflect ("SYMMETRIC") padding, central difference.
    xp = jnp.pad(x, ((0, 0), (0, 0), (1, 1), (1, 1)), mode="reflect")
    dy = 0.5 * (xp[:, :, 2:, 1:-1] - xp[:, :, :-2, 1:-1])
    dx = 0.5 * (xp[:, :, 1:-1, 2:] - xp[:, :, 1:-1, :-2])
    return dy, dx


def poisson_ref(vector_field):
    uy, ux = _cdiff_ref(vector_field[:, 0:1, :, :])
    vy, vx = _cdiff_ref(vector_field[:, 1:2, :, :])
    return ux * ux, vy * vy, uy * vx


if __name__ == "__main__":
    key = jax.random.PRNGKey(0)
    N, C, H, W = 2, 2, 16, 16
    vector_field = jax.random.normal(key, (N, C, H, W), dtype=jnp.float32)

    ux2, vy2, uyvx = poisson_pallas(vector_field)
    jax.block_until_ready((ux2, vy2, uyvx))

    r_ux2, r_vy2, r_uyvx = poisson_ref(vector_field)
    assert ux2.shape == (N, 1, H, W)
    assert vy2.shape == (N, 1, H, W)
    assert uyvx.shape == (N, 1, H, W)
    assert jnp.allclose(ux2, r_ux2, atol=1e-5, rtol=1e-5)
    assert jnp.allclose(vy2, r_vy2, atol=1e-5, rtol=1e-5)
    assert jnp.allclose(uyvx, r_uyvx, atol=1e-5, rtol=1e-5)

    print("KERNEL_OK")
</pallas_src>

<mosaic_0001>
module attributes {stable_mosaic.version = 11 : i64} {
  func.func @_poisson_kernel(%arg0: i32, %arg1: memref<2x2x16x16xf32, #tpu.memory_space<vmem>>, %arg2: memref<2x3x16x16xf32, #tpu.memory_space<vmem>>) attributes {dimension_semantics = [#tpu.dimension_semantics<parallel>], iteration_bounds = array<i64: 1>, scalar_prefetch = 0 : i64, scratch_operands = 0 : i64, tpu.core_type = #tpu.core_type<tc>, window_params = [{transform_indices = @transform_0, window_bounds = array<i64: 2, 2, 16, 16>}, {transform_indices = @transform_1, window_bounds = array<i64: 2, 3, 16, 16>}]} {
    %0 = tpu.iota {dimensions = array<i32: 0>} : vector<16x1xi32>
    %1 = tpu.iota {dimensions = array<i32: 1>} : vector<1x16xi32>
    %c0_i32 = arith.constant 0 : i32
    %2 = vector.broadcast %c0_i32 : i32 to vector<16x1xi32>
    %3 = arith.cmpi sgt, %0, %2 : vector<16x1xi32>
    %c15_i32 = arith.constant 15 : i32
    %4 = vector.broadcast %c15_i32 : i32 to vector<16x1xi32>
    %5 = arith.cmpi slt, %0, %4 : vector<16x1xi32>
    %6 = arith.andi %3, %5 : vector<16x1xi1>
    %c0_i32_0 = arith.constant 0 : i32
    %7 = vector.broadcast %c0_i32_0 : i32 to vector<1x16xi32>
    %8 = arith.cmpi sgt, %1, %7 : vector<1x16xi32>
    %c15_i32_1 = arith.constant 15 : i32
    %9 = vector.broadcast %c15_i32_1 : i32 to vector<1x16xi32>
    %10 = arith.cmpi slt, %1, %9 : vector<1x16xi32>
    %11 = arith.andi %8, %10 : vector<1x16xi1>
    %12 = vector.broadcast %6 : vector<16x1xi1> to vector<16x16xi1>
    %13 = vector.broadcast %11 : vector<1x16xi1> to vector<16x16xi1>
    %14 = arith.andi %12, %13 : vector<16x16xi1>
    %c0 = arith.constant 0 : index
    %c0_2 = arith.constant 0 : index
    %c0_3 = arith.constant 0 : index
    %c0_4 = arith.constant 0 : index
    %15 = vector.load %arg1[%c0, %c0_2, %c0_3, %c0_4] : memref<2x2x16x16xf32, #tpu.memory_space<vmem>>, vector<1x1x16x16xf32>
    %16 = vector.shape_cast %15 : vector<1x1x16x16xf32> to vector<16x16xf32>
    %c0_5 = arith.constant 0 : index
    %c1 = arith.constant 1 : index
    %c0_6 = arith.constant 0 : index
    %c0_7 = arith.constant 0 : index
    %17 = vector.load %arg1[%c0_5, %c1, %c0_6, %c0_7] : memref<2x2x16x16xf32, #tpu.memory_space<vmem>>, vector<1x1x16x16xf32>
    %18 = vector.shape_cast %17 : vector<1x1x16x16xf32> to vector<16x16xf32>
    %c15_i32_8 = arith.constant 15 : i32
    %19 = tpu.dynamic_rotate %16 by %c15_i32_8 dim 0 : vector<16x16xf32>, i32 -> vector<16x16xf32>
    %c1_i32 = arith.constant 1 : i32
    %20 = tpu.dynamic_rotate %16 by %c1_i32 dim 0 : vector<16x16xf32>, i32 -> vector<16x16xf32>
    %21 = arith.subf %19, %20 : vector<16x16xf32>
    %c15_i32_9 = arith.constant 15 : i32
    %22 = tpu.dynamic_rotate %16 by %c15_i32_9 dim 1 : vector<16x16xf32>, i32 -> vector<16x16xf32>
    %c1_i32_10 = arith.constant 1 : i32
    %23 = tpu.dynamic_rotate %16 by %c1_i32_10 dim 1 : vector<16x16xf32>, i32 -> vector<16x16xf32>
    %24 = arith.subf %22, %23 : vector<16x16xf32>
    %c15_i32_11 = arith.constant 15 : i32
    %25 = tpu.dynamic_rotate %18 by %c15_i32_11 dim 0 : vector<16x16xf32>, i32 -> vector<16x16xf32>
    %c1_i32_12 = arith.constant 1 : i32
    %26 = tpu.dynamic_rotate %18 by %c1_i32_12 dim 0 : vector<16x16xf32>, i32 -> vector<16x16xf32>
    %27 = arith.subf %25, %26 : vector<16x16xf32>
    %c15_i32_13 = arith.constant 15 : i32
    %28 = tpu.dynamic_rotate %18 by %c15_i32_13 dim 1 : vector<16x16xf32>, i32 -> vector<16x16xf32>
    %c1_i32_14 = arith.constant 1 : i32
    %29 = tpu.dynamic_rotate %18 by %c1_i32_14 dim 1 : vector<16x16xf32>, i32 -> vector<16x16xf32>
    %30 = arith.subf %28, %29 : vector<16x16xf32>
    %31 = arith.mulf %24, %24 : vector<16x16xf32>
    %cst = arith.constant 2.500000e-01 : f32
    %32 = vector.broadcast %cst : f32 to vector<16x16xf32>
    %33 = arith.mulf %32, %31 : vector<16x16xf32>
    %cst_15 = arith.constant 0.000000e+00 : f32
    %34 = vector.shape_cast %11 : vector<1x16xi1> to vector<1x16xi1>
    %35 = vector.broadcast %34 : vector<1x16xi1> to vector<16x16xi1>
    %36 = vector.broadcast %cst_15 : f32 to vector<16x16xf32>
    %37 = arith.select %35, %33, %36 : vector<16x16xi1>, vector<16x16xf32>
    %c0_16 = arith.constant 0 : index
    %c0_17 = arith.constant 0 : index
    %c0_18 = arith.constant 0 : index
    %c0_19 = arith.constant 0 : index
    %38 = vector.load %arg2[%c0_16, %c0_17, %c0_18, %c0_19] : memref<2x3x16x16xf32, #tpu.memory_space<vmem>>, vector<1x1x16x16xf32>
    %39 = vector.shape_cast %38 : vector<1x1x16x16xf32> to vector<16x16xf32>
    %40 = vector.shape_cast %37 : vector<16x16xf32> to vector<1x1x16x16xf32>
    tpu.vector_store %arg2[%c0_16, %c0_17, %c0_18, %c0_19], %40 {strides = array<i32>} : memref<2x3x16x16xf32, #tpu.memory_space<vmem>>, vector<1x1x16x16xf32>,
    %41 = arith.mulf %27, %27 : vector<16x16xf32>
    %cst_20 = arith.constant 2.500000e-01 : f32
    %42 = vector.broadcast %cst_20 : f32 to vector<16x16xf32>
    %43 = arith.mulf %42, %41 : vector<16x16xf32>
    %cst_21 = arith.constant 0.000000e+00 : f32
    %44 = vector.shape_cast %6 : vector<16x1xi1> to vector<16x1xi1>
    %45 = vector.broadcast %44 : vector<16x1xi1> to vector<16x16xi1>
    %46 = vector.broadcast %cst_21 : f32 to vector<16x16xf32>
    %47 = arith.select %45, %43, %46 : vector<16x16xi1>, vector<16x16xf32>
    %c0_22 = arith.constant 0 : index
    %c1_23 = arith.constant 1 : index
    %c0_24 = arith.constant 0 : index
    %c0_25 = arith.constant 0 : index
    %48 = vector.load %arg2[%c0_22, %c1_23, %c0_24, %c0_25] : memref<2x3x16x16xf32, #tpu.memory_space<vmem>>, vector<1x1x16x16xf32>
    %49 = vector.shape_cast %48 : vector<1x1x16x16xf32> to vector<16x16xf32>
    %50 = vector.shape_cast %47 : vector<16x16xf32> to vector<1x1x16x16xf32>
    tpu.vector_store %arg2[%c0_22, %c1_23, %c0_24, %c0_25], %50 {strides = array<i32>} : memref<2x3x16x16xf32, #tpu.memory_space<vmem>>, vector<1x1x16x16xf32>,
    %51 = arith.mulf %21, %30 : vector<16x16xf32>
    %cst_26 = arith.constant 2.500000e-01 : f32
    %52 = vector.broadcast %cst_26 : f32 to vector<16x16xf32>
    %53 = arith.mulf %52, %51 : vector<16x16xf32>
    %cst_27 = arith.constant 0.000000e+00 : f32
    %54 = vector.broadcast %cst_27 : f32 to vector<16x16xf32>
    %55 = arith.select %14, %53, %54 : vector<16x16xi1>, vector<16x16xf32>
    %c0_28 = arith.constant 0 : index
    %c2 = arith.constant 2 : index
    %c0_29 = arith.constant 0 : index
    %c0_30 = arith.constant 0 : index
    %56 = vector.load %arg2[%c0_28, %c2, %c0_29, %c0_30] : memref<2x3x16x16xf32, #tpu.memory_space<vmem>>, vector<1x1x16x16xf32>
    %57 = vector.shape_cast %56 : vector<1x1x16x16xf32> to vector<16x16xf32>
    %58 = vector.shape_cast %55 : vector<16x16xf32> to vector<1x1x16x16xf32>
    tpu.vector_store %arg2[%c0_28, %c2, %c0_29, %c0_30], %58 {strides = array<i32>} : memref<2x3x16x16xf32, #tpu.memory_space<vmem>>, vector<1x1x16x16xf32>,
    %c1_31 = arith.constant 1 : index
    %c0_32 = arith.constant 0 : index
    %c0_33 = arith.constant 0 : index
    %c0_34 = arith.constant 0 : index
    %59 = vector.load %arg1[%c1_31, %c0_32, %c0_33, %c0_34] : memref<2x2x16x16xf32, #tpu.memory_space<vmem>>, vector<1x1x16x16xf32>
    %60 = vector.shape_cast %59 : vector<1x1x16x16xf32> to vector<16x16xf32>
    %c1_35 = arith.constant 1 : index
    %c1_36 = arith.constant 1 : index
    %c0_37 = arith.constant 0 : index
    %c0_38 = arith.constant 0 : index
    %61 = vector.load %arg1[%c1_35, %c1_36, %c0_37, %c0_38] : memref<2x2x16x16xf32, #tpu.memory_space<vmem>>, vector<1x1x16x16xf32>
    %62 = vector.shape_cast %61 : vector<1x1x16x16xf32> to vector<16x16xf32>
    %c15_i32_39 = arith.constant 15 : i32
    %63 = tpu.dynamic_rotate %60 by %c15_i32_39 dim 0 : vector<16x16xf32>, i32 -> vector<16x16xf32>
    %c1_i32_40 = arith.constant 1 : i32
    %64 = tpu.dynamic_rotate %60 by %c1_i32_40 dim 0 : vector<16x16xf32>, i32 -> vector<16x16xf32>
    %65 = arith.subf %63, %64 : vector<16x16xf32>
    %c15_i32_41 = arith.constant 15 : i32
    %66 = tpu.dynamic_rotate %60 by %c15_i32_41 dim 1 : vector<16x16xf32>, i32 -> vector<16x16xf32>
    %c1_i32_42 = arith.constant 1 : i32
    %67 = tpu.dynamic_rotate %60 by %c1_i32_42 dim 1 : vector<16x16xf32>, i32 -> vector<16x16xf32>
    %68 = arith.subf %66, %67 : vector<16x16xf32>
    %c15_i32_43 = arith.constant 15 : i32
    %69 = tpu.dynamic_rotate %62 by %c15_i32_43 dim 0 : vector<16x16xf32>, i32 -> vector<16x16xf32>
    %c1_i32_44 = arith.constant 1 : i32
    %70 = tpu.dynamic_rotate %62 by %c1_i32_44 dim 0 : vector<16x16xf32>, i32 -> vector<16x16xf32>
    %71 = arith.subf %69, %70 : vector<16x16xf32>
    %c15_i32_45 = arith.constant 15 : i32
    %72 = tpu.dynamic_rotate %62 by %c15_i32_45 dim 1 : vector<16x16xf32>, i32 -> vector<16x16xf32>
    %c1_i32_46 = arith.constant 1 : i32
    %73 = tpu.dynamic_rotate %62 by %c1_i32_46 dim 1 : vector<16x16xf32>, i32 -> vector<16x16xf32>
    %74 = arith.subf %72, %73 : vector<16x16xf32>
    %75 = arith.mulf %68, %68 : vector<16x16xf32>
    %cst_47 = arith.constant 2.500000e-01 : f32
    %76 = vector.broadcast %cst_47 : f32 to vector<16x16xf32>
    %77 = arith.mulf %76, %75 : vector<16x16xf32>
    %cst_48 = arith.constant 0.000000e+00 : f32
    %78 = vector.shape_cast %11 : vector<1x16xi1> to vector<1x16xi1>
    %79 = vector.broadcast %78 : vector<1x16xi1> to vector<16x16xi1>
    %80 = vector.broadcast %cst_48 : f32 to vector<16x16xf32>
    %81 = arith.select %79, %77, %80 : vector<16x16xi1>, vector<16x16xf32>
    %c1_49 = arith.constant 1 : index
    %c0_50 = arith.constant 0 : index
    %c0_51 = arith.constant 0 : index
    %c0_52 = arith.constant 0 : index
    %82 = vector.load %arg2[%c1_49, %c0_50, %c0_51, %c0_52] : memref<2x3x16x16xf32, #tpu.memory_space<vmem>>, vector<1x1x16x16xf32>
    %83 = vector.shape_cast %82 : vector<1x1x16x16xf32> to vector<16x16xf32>
    %84 = vector.shape_cast %81 : vector<16x16xf32> to vector<1x1x16x16xf32>
    tpu.vector_store %arg2[%c1_49, %c0_50, %c0_51, %c0_52], %84 {strides = array<i32>} : memref<2x3x16x16xf32, #tpu.memory_space<vmem>>, vector<1x1x16x16xf32>,
    %85 = arith.mulf %71, %71 : vector<16x16xf32>
    %cst_53 = arith.constant 2.500000e-01 : f32
    %86 = vector.broadcast %cst_53 : f32 to vector<16x16xf32>
    %87 = arith.mulf %86, %85 : vector<16x16xf32>
    %cst_54 = arith.constant 0.000000e+00 : f32
    %88 = vector.shape_cast %6 : vector<16x1xi1> to vector<16x1xi1>
    %89 = vector.broadcast %88 : vector<16x1xi1> to vector<16x16xi1>
    %90 = vector.broadcast %cst_54 : f32 to vector<16x16xf32>
    %91 = arith.select %89, %87, %90 : vector<16x16xi1>, vector<16x16xf32>
    %c1_55 = arith.constant 1 : index
    %c1_56 = arith.constant 1 : index
    %c0_57 = arith.constant 0 : index
    %c0_58 = arith.constant 0 : index
    %92 = vector.load %arg2[%c1_55, %c1_56, %c0_57, %c0_58] : memref<2x3x16x16xf32, #tpu.memory_space<vmem>>, vector<1x1x16x16xf32>
    %93 = vector.shape_cast %92 : vector<1x1x16x16xf32> to vector<16x16xf32>
    %94 = vector.shape_cast %91 : vector<16x16xf32> to vector<1x1x16x16xf32>
    tpu.vector_store %arg2[%c1_55, %c1_56, %c0_57, %c0_58], %94 {strides = array<i32>} : memref<2x3x16x16xf32, #tpu.memory_space<vmem>>, vector<1x1x16x16xf32>,
    %95 = arith.mulf %65, %74 : vector<16x16xf32>
    %cst_59 = arith.constant 2.500000e-01 : f32
    %96 = vector.broadcast %cst_59 : f32 to vector<16x16xf32>
    %97 = arith.mulf %96, %95 : vector<16x16xf32>
    %cst_60 = arith.constant 0.000000e+00 : f32
    %98 = vector.broadcast %cst_60 : f32 to vector<16x16xf32>
    %99 = arith.select %14, %97, %98 : vector<16x16xi1>, vector<16x16xf32>
    %c1_61 = arith.constant 1 : index
    %c2_62 = arith.constant 2 : index
    %c0_63 = arith.constant 0 : index
    %c0_64 = arith.constant 0 : index
    %100 = vector.load %arg2[%c1_61, %c2_62, %c0_63, %c0_64] : memref<2x3x16x16xf32, #tpu.memory_space<vmem>>, vector<1x1x16x16xf32>
    %101 = vector.shape_cast %100 : vector<1x1x16x16xf32> to vector<16x16xf32>
    %102 = vector.shape_cast %99 : vector<16x16xf32> to vector<1x1x16x16xf32>
    tpu.vector_store %arg2[%c1_61, %c2_62, %c0_63, %c0_64], %102 {strides = array<i32>} : memref<2x3x16x16xf32, #tpu.memory_space<vmem>>, vector<1x1x16x16xf32>,
    return
  }
  func.func @transform_0(%arg0: i32) -> (i32, i32, i32, i32) {
    %c0_i32 = arith.constant 0 : i32
    %c0_i32_0 = arith.constant 0 : i32
    %c0_i32_1 = arith.constant 0 : i32
    %c0_i32_2 = arith.constant 0 : i32
    return %arg0, %c0_i32, %c0_i32_0, %c0_i32_1 : i32, i32, i32, i32
  }
  func.func @transform_1(%arg0: i32) -> (i32, i32, i32, i32) {
    %c0_i32 = arith.constant 0 : i32
    %c0_i32_0 = arith.constant 0 : i32
    %c0_i32_1 = arith.constant 0 : i32
    %c0_i32_2 = arith.constant 0 : i32
    return %arg0, %c0_i32, %c0_i32_0, %c0_i32_1 : i32, i32, i32, i32
  }
}

</mosaic_0001>

<bundles_post_ra>
// kernel: tpu_custom_call.1
= control target key start
LH: loop header
LB: loop body
LE: loop exit
PB: predicated region body
PF: predicated region fallthrough
CT: control target
= control target key end

     0   :  { %6 = vsyncpa [#allocation3], 0  ;;  %s608_s0 = inlined_call_operand.hbm [shape: f32[2,2,16,16], index: 0, kind: input, shape index: {}]   ;;  %s609_s1 = inlined_call_operand.hbm [shape: f32[2,3,16,16], index: 1, kind: output, shape index: {}]  }
   0x1   :  { %7 = vsyncpa [#allocation4], 0  ;;  %s345_s6 = smov [#allocation2]   ;;  %s297_s10 = scalar_lea.hbm %s608_s0, 1024 }
   0x2   :  { %s13_s7 = sshll.u32 %s345_s6, 4  ;;  %p298_p0 = scmp.ne.s32.totalorder %s608_s0, %s297_s10  ;;  %s14_s7 = int_to_ptr.vmem [resolvable:$true] %s13_s7 }
   0x3   :  { %p301_p1 = scmp.lt.u32.totalorder %s297_s10, %s608_s0 }
   0x5   :  { %p303_p2 = pnand %p301_p1, %p298_p0 }
   0x7   :  { %306 = shalt.err (!%p303_p2)
}
   0x8   :  { %s307_s15 = scalar_lea.vmem %s14_s7, 1024  ;;  %p312_p4 = scmp.lt.s32.totalorder %s14_s7, %s14_s7 }
   0x9   :  { %p308_p3 = scmp.ne.s32.totalorder %s14_s7, %s307_s15  ;;  %p313_p5 = scmp.lt.s32.totalorder %s307_s15, %s307_s15 }
   0xb   :  { %p314_p6 = por %p313_p5, %p312_p4 }
   0xd   :  { %p315_p7 = pnand %p314_p6, %p308_p3 }
   0xf   :  { %318 = shalt.err (!%p315_p7)
}
  0x10   :  { %s346_s16 = smov 128   ;;  %s347_s17 = smov 8  }
  0x11   :  { %19 = dma.hbm_to_vmem [thread:$0]  %s608_s0, 1024, %s14_s7, [#allocation3], %s346_s16, %s346_s16, %s347_s17  }
  0x12   :  { %341 = dma.done.wait [#allocation3], 1024  }
  0x13   :  { %342 = vsyncadd [#allocation3], 4294966272  ;;  %v377_v0 = vld [vmem:[#allocation2] sm:$0xff]  ;;  %v379_v1 = vld [vmem:[#allocation2 + $0x10] sm:$0xff]  ;;  %s348_s20 = smov 16   ;;  %vm62_vm0 = vcmask 1047680   ;;  %v23_v41 = vlaneseq }
  0x14   :  { %63 = vrot.lane.b32.xlu0 %v377_v0, %s348_s20  ;;  %95 = vrot.lane.b32.xlu1 %v379_v1, %s348_s20  ;;  %v385_v2 = vld [vmem:[#allocation2 + $0x8] sm:$0xff]  ;;  %v387_v3 = vld [vmem:[#allocation2 + $0x18] sm:$0xff]  ;;  %v393_v4 = vld [vmem:[#allocation2 + $0x20] sm:$0xff]  ;;  %s349_s0 = smov 114   ;;  %v85_v38 = vrot.slane %v379_v1, 1  ;;  %v89_v39 = vrot.slane %v379_v1, 7 }
  0x15   :  { %v395_v5 = vld [vmem:[#allocation2 + $0x28] sm:$0xff]  ;;  %v401_v6 = vld [vmem:[#allocation2 + $0x30] sm:$0xff]  ;;  %v403_v7 = vld [vmem:[#allocation2 + $0x38] sm:$0xff]  ;;  %v86_v40 = vrot.slane %v387_v3, 1  ;;  %v90_v42 = vrot.slane %v387_v3, 7  ;;  %v487_v49 = vshrl.u32 %v23_v41, 7 }
  0x16   :  { %v198_v43 = vrot.slane %v401_v6, 1  ;;  %v202_v44 = vrot.slane %v401_v6, 7  ;;  %v199_v45 = vrot.slane %v403_v7, 1  ;;  %v203_v47 = vrot.slane %v403_v7, 7  ;;  %s350_s21 = smov 127   ;;  %s351_s22 = smov [#allocation5]  }
  0x17   :  { %v27_v50 = vand.u32 127, %v23_v41  ;;  %vm28_vm1 = vcmp.gt.s32.totalorder %v487_v49, 0  ;;  %vm52_vm4 = vcmp.lt.s32.totalorder %v487_v49, 7  ;;  %vm57_vm6 = vcmp.lt.s32.totalorder %v487_v49, 1  ;;  %s278_s23 = sshll.u32 %s351_s22, 4  ;;  %s279_s23 = int_to_ptr.vmem [resolvable:$true] %s278_s23 }
  0x18   :  { %66 = vrot.lane.b32.xlu0 %v385_v2, %s348_s20  ;;  %98 = vrot.lane.b32.xlu1 %v387_v3, %s348_s20  ;;  %v87_v52 = vsel %vm52_vm4, %v85_v38, %v86_v40  ;;  %v200_v53 = vsel %vm52_vm4, %v198_v43, %v199_v45  ;;  %v92_v55 = vsel %vm57_vm6, %v90_v42, %v89_v39  ;;  %vm131_vm8 = vcmask 130048   ;;  %s319_s24 = scalar_lea.vmem %s279_s23, 1536  ;;  %p324_p9 = scmp.lt.s32.totalorder %s279_s23, %s279_s23 }
  0x19   :  { %vm34_vm2 = vcmp.gt.s32.totalorder %v27_v50, 0  ;;  %vm35_vm3 = vcmp.lt.s32.totalorder %v27_v50, 15  ;;  %v205_v56 = vsel %vm57_vm6, %v203_v47, %v202_v44  ;;  %v93_v57 = vsub.f32 %v87_v52, %v92_v55  ;;  %p320_p8 = scmp.ne.s32.totalorder %s279_s23, %s319_s24  ;;  %p325_p10 = scmp.lt.s32.totalorder %s319_s24, %s319_s24 }
  0x1a   :  { %vm493_vm5 = vmand %vm34_vm2, %vm35_vm3  ;;  %v206_v58 = vsub.f32 %v200_v53, %v205_v56  ;;  %v166_v55 = vrot.slane %v393_v4, 1  ;;  %v170_v56 = vrot.slane %v393_v4, 7 }
  0x1b   :  { %vm506_vm7 = vmand %vm28_vm1, %vm493_vm5  ;;  %v134_v59 = vmul.f32 %v93_v57, %v93_v57  ;;  %p326_p11 = por %p325_p10, %p324_p9 }
  0x1c   :  { %176 = vrot.lane.b32.xlu0 %v393_v4, %s348_s20  ;;  %179 = vrot.lane.b32.xlu1 %v395_v5, %s348_s20  ;;  %v247_v60 = vmul.f32 %v206_v58, %v206_v58 }
  0x1d   :  { %v136_v61 = vmul.f32 0.25, %v134_v59  ;;  %p327_p12 = pnand %p326_p11, %p320_p8 }
  0x1e   :  { %v249_v62 = vmul.f32 0.25, %v247_v60 }
  0x1f   :  { %v138_v63 = vsel %vm28_vm1, %v136_v61, 0.0 }
  0x20   :  { %208 = vrot.lane.b32.xlu0 %v401_v6, %s348_s20  ;;  %211 = vrot.lane.b32.xlu1 %v403_v7, %s348_s20  ;;  %141 = vst.msk [vmem:[#allocation5 + $0x10] sm:$0xff] %vm131_vm8, %v138_v63 }
  0x86   :  { %v64_v8 = vpop.permute.xlu0 %63  ;;  %v96_v9 = vpop.permute.xlu1 %95 }
  0x87   :  { %v65_v10 = vsel %vm62_vm0, %v64_v8, %v377_v0  ;;  %v97_v11 = vsel %vm62_vm0, %v96_v9, %v379_v1  ;;  %v201_v8 = vsel %vm52_vm4, %v199_v45, %v198_v43  ;;  %v204_v9 = vsel %vm57_vm6, %v202_v44, %v203_v47 }
  0x88   :  { %69 = vrot.lane.b32.xlu0 %v65_v10, %s348_s20  ;;  %v55_v47 = vrot.slane %v377_v0, 7 }
  0x8a   :  { %v67_v12 = vpop.permute.xlu0 %66  ;;  %v99_v13 = vpop.permute.xlu1 %98 }
  0x8b   :  { %v68_v14 = vsel %vm62_vm0, %v67_v12, %v385_v2  ;;  %v100_v15 = vsel %vm62_vm0, %v99_v13, %v387_v3  ;;  %v207_v12 = vsub.f32 %v201_v8, %v204_v9 }
  0x8c   :  { %101 = vrot.lane.b32.xlu0 %v97_v11, %s348_s20  ;;  %71 = vrot.lane.b32.xlu1 %v68_v14, %s348_s20 }
  0x8e   :  { %v177_v16 = vpop.permute.xlu0 %176  ;;  %v180_v17 = vpop.permute.xlu1 %179 }
  0x8f   :  { %v178_v18 = vsel %vm62_vm0, %v177_v16, %v393_v4  ;;  %v181_v19 = vsel %vm62_vm0, %v180_v17, %v395_v5 }
  0x90   :  { %103 = vrot.lane.b32.xlu1 %v100_v15, %s348_s20  ;;  %182 = vrot.lane.b32.xlu0 %v178_v18, %s348_s20  ;;  %v248_v15 = vmul.f32 %v207_v12, %v207_v12 }
  0x92   :  { %v209_v20 = vpop.permute.xlu0 %208  ;;  %v212_v21 = vpop.permute.xlu1 %211 }
  0x93   :  { %v210_v22 = vsel %vm62_vm0, %v209_v20, %v401_v6  ;;  %v213_v23 = vsel %vm62_vm0, %v212_v21, %v403_v7 }
  0x94   :  { %184 = vrot.lane.b32.xlu1 %v181_v19, %s348_s20  ;;  %214 = vrot.lane.b32.xlu0 %v210_v22, %s348_s20  ;;  %v250_v19 = vmul.f32 0.25, %v248_v15 }
  0x98   :  { %216 = vrot.lane.b32.xlu1 %v213_v23, %s348_s20 }
  0xfa   :  { %v70_v24 = vpop.permute.xlu0 %69 }
  0xfb   :  { %v435_v25 = vsel %vm62_vm0, %v70_v24, %v377_v0 }
  0xfc   :  { %77 = vrot.lane.b32.xlu0 %v435_v25, %s349_s0 }
  0xfe   :  { %v72_v26 = vpop.permute.xlu1 %71  ;;  %v102_v27 = vpop.permute.xlu0 %101 }
  0xff   :  { %v441_v28 = vsel %vm62_vm0, %v72_v26, %v385_v2  ;;  %v445_v29 = vsel %vm62_vm0, %v102_v27, %v379_v1  ;;  %v251_v1 = vsel %vm28_vm1, %v249_v62, 0.0 }
 0x100   :  { %79 = vrot.lane.b32.xlu1 %v441_v28, %s349_s0  ;;  %109 = vrot.lane.b32.xlu0 %v445_v29, %s349_s0  ;;  %254 = vst.msk [vmem:[#allocation5 + $0x40] sm:$0xff] %vm131_vm8, %v251_v1 }
 0x102   :  { %v104_v30 = vpop.permute.xlu1 %103  ;;  %v183_v31 = vpop.permute.xlu0 %182 }
 0x103   :  { %v453_v32 = vsel %vm62_vm0, %v104_v30, %v387_v3  ;;  %v457_v33 = vsel %vm62_vm0, %v183_v31, %v393_v4  ;;  %v25_v3 = vadd.s32 8, %v487_v49 }
 0x104   :  { %111 = vrot.lane.b32.xlu1 %v453_v32, %s349_s0  ;;  %190 = vrot.lane.b32.xlu0 %v457_v33, %s349_s0 }
 0x105   :  { %vm31_vm9 = vcmp.lt.s32.totalorder %v25_v3, 15 }
 0x106   :  { %v185_v34 = vpop.permute.xlu1 %184  ;;  %v215_v35 = vpop.permute.xlu0 %214  ;;  %vm531_vm10 = vmand %vm31_vm9, %vm493_vm5  ;;  %v252_v22 = vsel %vm31_vm9, %v250_v19, 0.0 }
 0x107   :  { %v465_v36 = vsel %vm62_vm0, %v185_v34, %v395_v5  ;;  %v469_v37 = vsel %vm62_vm0, %v215_v35, %v401_v6  ;;  %v88_v6 = vsel %vm52_vm4, %v86_v40, %v85_v38  ;;  %255 = vst.msk [vmem:[#allocation5 + $0x48] sm:$0xff] %vm131_vm8, %v252_v22 }
 0x108   :  { %192 = vrot.lane.b32.xlu1 %v465_v36, %s349_s0  ;;  %222 = vrot.lane.b32.xlu0 %v469_v37, %s349_s0 }
 0x10a   :  { %v217_v46 = vpop.permute.xlu1 %216 }
 0x10b   :  { %v485_v48 = vsel %vm62_vm0, %v217_v46, %v403_v7  ;;  %v91_v7 = vsel %vm57_vm6, %v89_v39, %v90_v42  ;;  %v50_v46 = vrot.slane %v377_v0, 1  ;;  %v171_v0 = vrot.slane %v395_v5, 7 }
 0x10c   :  { %224 = vrot.lane.b32.xlu1 %v485_v48, %s349_s0  ;;  %v94_v11 = vsub.f32 %v88_v6, %v91_v7 }
 0x10d   :  { %v173_v61 = vsel %vm57_vm6, %v171_v0, %v170_v56 }
 0x10e   :  { %v135_v14 = vmul.f32 %v94_v11, %v94_v11 }
 0x110   :  { %v137_v18 = vmul.f32 0.25, %v135_v14 }
 0x112   :  { %v139_v21 = vsel %vm31_vm9, %v137_v18, 0.0 }
 0x113   :  { %142 = vst.msk [vmem:[#allocation5 + $0x18] sm:$0xff] %vm131_vm8, %v139_v21 }
 0x16e   :  { %v78_v10 = vpop.permute.xlu0 %77 }
 0x16f   :  { %v83_v23 = vsub.f32 %v435_v25, %v78_v10 }
 0x171   :  { %v117_v30 = vmul.f32 %v83_v23, %v83_v23 }
 0x172   :  { %v80_v16 = vpop.permute.xlu1 %79  ;;  %v110_v17 = vpop.permute.xlu0 %109 }
 0x173   :  { %v115_v20 = vsub.f32 %v445_v29, %v110_v17  ;;  %v84_v29 = vsub.f32 %v441_v28, %v80_v16  ;;  %v119_v39 = vmul.f32 0.25, %v117_v30 }
 0x175   :  { %145 = vrot.lane.b32.xlu0 %v115_v20, %s350_s21  ;;  %v118_v41 = vmul.f32 %v84_v29, %v84_v29 }
 0x176   :  { %v112_v24 = vpop.permute.xlu1 %111  ;;  %v191_v26 = vpop.permute.xlu0 %190 }
 0x177   :  { %v116_v27 = vsub.f32 %v453_v32, %v112_v24  ;;  %v196_v35 = vsub.f32 %v457_v33, %v191_v26  ;;  %v120_v32 = vmul.f32 0.25, %v118_v41  ;;  %v51_v33 = vrot.slane %v385_v2, 1 }
 0x179   :  { %147 = vrot.lane.b32.xlu1 %v116_v27, %s350_s21  ;;  %v230_v42 = vmul.f32 %v196_v35, %v196_v35  ;;  %v54_v52 = vsel %vm52_vm4, %v51_v33, %v50_v46 }
 0x17a   :  { %v193_v31 = vpop.permute.xlu1 %192  ;;  %v223_v34 = vpop.permute.xlu0 %222 }
 0x17b   :  { %v228_v38 = vsub.f32 %v469_v37, %v223_v34  ;;  %v197_v25 = vsub.f32 %v465_v36, %v193_v31  ;;  %v232_v44 = vmul.f32 0.25, %v230_v42  ;;  %v56_v37 = vrot.slane %v385_v2, 7 }
 0x17c   :  { %v53_v36 = vsel %vm52_vm4, %v50_v46, %v51_v33  ;;  %v167_v2 = vrot.slane %v395_v5, 1  ;;  %v172_v5 = vsel %vm57_vm6, %v170_v56, %v171_v0 }
 0x17d   :  { %258 = vrot.lane.b32.xlu0 %v228_v38, %s350_s21  ;;  %v231_v45 = vmul.f32 %v197_v25, %v197_v25  ;;  %v58_v53 = vsel %vm57_vm6, %v55_v47, %v56_v37 }
 0x17e   :  { %v225_v40 = vpop.permute.xlu1 %224  ;;  %v61_v59 = vsub.f32 %v54_v52, %v58_v53  ;;  %v168_v60 = vsel %vm52_vm4, %v166_v55, %v167_v2  ;;  %v169_v4 = vsel %vm52_vm4, %v167_v2, %v166_v55 }
 0x17f   :  { %v229_v43 = vsub.f32 %v485_v48, %v225_v40  ;;  %v233_v28 = vmul.f32 0.25, %v231_v45  ;;  %v59_v48 = vsel %vm57_vm6, %v56_v37, %v55_v47  ;;  %v174_v6 = vsub.f32 %v168_v60, %v173_v61 }
 0x180   :  { %v60_v50 = vsub.f32 %v53_v36, %v59_v48  ;;  %v175_v11 = vsub.f32 %v169_v4, %v172_v5 }
 0x181   :  { %260 = vrot.lane.b32.xlu1 %v229_v43, %s350_s21  ;;  %123 = vrot.lane.b32.xlu0 %v119_v39, %s350_s21 }
 0x185   :  { %125 = vrot.lane.b32.xlu1 %v120_v32, %s350_s21  ;;  %236 = vrot.lane.b32.xlu0 %v232_v44, %s350_s21 }
 0x189   :  { %238 = vrot.lane.b32.xlu1 %v233_v28, %s350_s21 }
 0x1e7   :  { %v146_v57 = vpop.permute.xlu0 %145 }
 0x1e8   :  { %v151_v58 = vmul.f32 %v146_v57, %v60_v50 }
 0x1ea   :  { %v153_v62 = vmul.f32 0.25, %v151_v58 }
 0x1eb   :  { %v148_v63 = vpop.permute.xlu1 %147 }
 0x1ec   :  { %v155_v1 = vsel %vm506_vm7, %v153_v62, 0.0  ;;  %v152_v3 = vmul.f32 %v148_v63, %v61_v59 }
 0x1ed   :  { %158 = vst.msk [vmem:[#allocation5 + $0x20] sm:$0xff] %vm131_vm8, %v155_v1 }
 0x1ee   :  { %v154_v7 = vmul.f32 0.25, %v152_v3 }
 0x1ef   :  { %v259_v8 = vpop.permute.xlu0 %258 }
 0x1f0   :  { %v156_v9 = vsel %vm531_vm10, %v154_v7, 0.0  ;;  %v264_v10 = vmul.f32 %v259_v8, %v174_v6 }
 0x1f1   :  { %159 = vst.msk [vmem:[#allocation5 + $0x28] sm:$0xff] %vm131_vm8, %v156_v9 }
 0x1f2   :  { %v266_v12 = vmul.f32 0.25, %v264_v10 }
 0x1f3   :  { %v261_v14 = vpop.permute.xlu1 %260  ;;  %v124_v15 = vpop.permute.xlu0 %123 }
 0x1f4   :  { %v268_v16 = vsel %vm506_vm7, %v266_v12, 0.0  ;;  %v265_v17 = vmul.f32 %v261_v14, %v175_v11  ;;  %v129_v49 = vsel %vm493_vm5, %v124_v15, 0.0 }
 0x1f5   :  { %271 = vst.msk [vmem:[#allocation5 + $0x50] sm:$0xff] %vm131_vm8, %v268_v16  ;;  %132 = vst.msk [vmem:[#allocation5] sm:$0xff] %vm131_vm8, %v129_v49 }
 0x1f6   :  { %v267_v18 = vmul.f32 0.25, %v265_v17 }
 0x1f7   :  { %v126_v19 = vpop.permute.xlu1 %125  ;;  %v237_v20 = vpop.permute.xlu0 %236 }
 0x1f8   :  { %v269_v21 = vsel %vm531_vm10, %v267_v18, 0.0  ;;  %v130_v22 = vsel %vm493_vm5, %v126_v19, 0.0  ;;  %v242_v54 = vsel %vm493_vm5, %v237_v20, 0.0 }
 0x1f9   :  { %272 = vst.msk [vmem:[#allocation5 + $0x58] sm:$0xff] %vm131_vm8, %v269_v21  ;;  %133 = vst.msk [vmem:[#allocation5 + $0x8] sm:$0xff] %vm131_vm8, %v130_v22 }
 0x1fa   :  { %245 = vst.msk [vmem:[#allocation5 + $0x30] sm:$0xff] %vm131_vm8, %v242_v54 }
 0x1fb   :  { %v239_v23 = vpop.permute.xlu1 %238 }
 0x1fc   :  { %v243_v13 = vsel %vm493_vm5, %v239_v23, 0.0 }
 0x1fd   :  { %246 = vst.msk [vmem:[#allocation5 + $0x38] sm:$0xff] %vm131_vm8, %v243_v13 }
 0x1fe   :  { %330 = shalt.err (!%p327_p12)
}
 0x1ff   :  { %s331_s27 = scalar_lea.hbm %s609_s1, 1536 }
 0x200   :  { %p332_p13 = scmp.ne.s32.totalorder %s609_s1, %s331_s27  ;;  %p335_p0 = scmp.lt.u32.totalorder %s331_s27, %s609_s1 }
 0x202   :  { %p337_p1 = pnand %p335_p0, %p332_p13 }
 0x204   :  { %340 = shalt.err (!%p337_p1)
}
 0x205   :  { %284 = dma.vmem_to_hbm [thread:$0]  %s279_s23, 1536, %s609_s1, [#allocation4], %s346_s16, %s346_s16, %s347_s17  }
 0x206   :  { %343 = dma.done.wait [#allocation4], 1536  }
 0x207   :  { %344 = vsyncadd [#allocation4], 4294965760 }
 0x208   :  { %288 = vsyncpa [#allocation3], 1 }
 0x209   :  { %289 = vsyncpa [#allocation4], 1 }

</bundles_post_ra>
